<compile_context>
chip_gen: v7x
topology: tpu7x:2x2x1
jax: 0.10.0
libtpu: 0.0.40
codegen_flags: <defaults>
</compile_context>

<pallas_src>
import functools

import numpy as np
import jax
import jax.numpy as jnp
from jax.experimental import pallas as pl
from jax.experimental.pallas import tpu as pltpu

ALPHA = 0.2     # stand-in for args.alpha from parameter_parser()


def _cdiv(a, b):
    return -(-a // b)


def _tpu_config():
    """(megacore split, VMEM scoped budget in bytes) for the local device."""
    try:
        kind = jax.devices()[0].device_kind.lower()
    except Exception:
        kind = ""
    is_v7 = "v7" in kind
    split = 2 if is_v7 else 1                           # 2 TensorCores/chip only on v7x
    vmem_limit = (32 << 20) if is_v7 else (64 << 20)    # v7x: 64 MiB phys; v5e/v6e: 128 MiB
    return split, vmem_limit


def _loss_kernel(*refs, alpha, M, N, n_ops, mask_rows, mask_cols):
    in_refs = refs[:n_ops]
    out_ref = refs[n_ops]
    acc_ref = refs[n_ops + 1]

    c = pl.program_id(0)          # megacore split     ("parallel")
    j = pl.program_id(1)          # row-tile step      ("arbitrary")
    k = pl.program_id(2)          # col-tile step      ("arbitrary")
    n_j = pl.num_programs(1)
    n_k = pl.num_programs(2)

    @pl.when((j == 0) & (k == 0))
    def _init():
        acc_ref[...] = jnp.zeros_like(acc_ref)

    # Operands stream from HBM in their native dtype; upcast in-register.
    x = in_refs[0][...].astype(jnp.float32)
    t = in_refs[1][...].astype(jnp.float32)
    d = x - t
    if n_ops == 2:
        # Fast path: one_index/zero_index partition the matrix by target, so the
        # per-element weight is derivable from target alone.
        w = alpha + (1.0 - 2.0 * alpha) * t
    else:
        # General path: int8 scatter-added counts for one_index / zero_index.
        w = ((1.0 - alpha) * in_refs[2][...].astype(jnp.float32)
             + alpha * in_refs[3][...].astype(jnp.float32))
    contrib = w * d * d

    tile_m, tile_n = contrib.shape
    if mask_rows or mask_cols:
        valid = None
        if mask_rows:
            rows = (c * n_j + j) * tile_m + jax.lax.broadcasted_iota(
                jnp.int32, (tile_m, tile_n), 0)
            valid = rows < M
        if mask_cols:
            cols = k * tile_n + jax.lax.broadcasted_iota(
                jnp.int32, (tile_m, tile_n), 1)
            vcols = cols < N
            valid = vcols if valid is None else (valid & vcols)
        contrib = jnp.where(valid, contrib, 0.0)     # where-select: garbage-safe

    # Pure VPU partial accumulation into the (8, tile_n) scratch.
    acc_ref[...] += contrib.reshape(tile_m // 8, 8, tile_n).sum(axis=0)

    @pl.when((j == n_j - 1) & (k == n_k - 1))
    def _finalize():
        total = jnp.sum(acc_ref[...], keepdims=True)   # single epilogue XLU reduce
        out_ref[...] = jnp.broadcast_to(total, out_ref.shape)


def _weighted_sq_err_sum(arrays, *, alpha, max_tile_m=None, max_tile_n=None):
    """sum_ij w_ij * (a0 - a1)_ij**2 via a streaming Pallas reduction.

    arrays = [input, target]                    -> w derived from target in-kernel
    arrays = [input, target, c1_int8, c0_int8]  -> w = (1-alpha)*c1 + alpha*c0
    """
    M, N = arrays[0].shape
    n_ops = len(arrays)
    split, vmem_limit = _tpu_config()

    sum_bytes = sum(jnp.dtype(a.dtype).itemsize for a in arrays)
    avail = max(vmem_limit - (2 << 20), 4 << 20)      # headroom for output/misc

    # ---- column (lane) tiling: keep full N unless a 32-row, double-buffered
    # stripe of all operands (+ f32 accumulator) would blow the VMEM budget.
    n_round = _cdiv(N, 128) * 128
    per_col128 = 2 * 32 * 128 * sum_bytes + 8 * 128 * 4
    tile_n = min(n_round, max(128, (avail // per_col128) * 128))
    if max_tile_n is not None:
        tile_n = max(128, min(tile_n, (max_tile_n // 128) * 128))
    if tile_n >= N:
        tile_n = N                                     # full lane extent
    n_k = _cdiv(N, tile_n)

    # ---- row (sublane) tiling: as large as fits, multiple of 32 so f32 / bf16 /
    # int8 sublane packing all stay aligned, capped at the per-core row count.
    scratch_bytes = 8 * tile_n * 4
    row_budget = max(32, ((avail - scratch_bytes) // (2 * tile_n * sum_bytes)) // 32 * 32)
    rows_cap = _cdiv(_cdiv(M, split), 32) * 32
    tile_m = min(row_budget, rows_cap)
    if max_tile_m is not None:
        tile_m = min(tile_m, max(32, (max_tile_m // 32) * 32))
    tile_m = max(32, tile_m)

    nb_r = _cdiv(M, tile_m)                 # total row blocks
    n_j = _cdiv(nb_r, split)                # row blocks per core
    mask_rows = split * n_j * tile_m > M
    mask_cols = n_k * tile_n > N

    if split * n_j > nb_r:
        # Odd block count on a 2-core chip: clamp the trailing (fully masked)
        # steps onto the last real block so the DMA stays in bounds.
        def in_map(c, j, k):
            return (jnp.minimum(c * n_j + j, nb_r - 1), k)
    else:
        def in_map(c, j, k):
            return (c * n_j + j, k)

    kernel = functools.partial(
        _loss_kernel, alpha=float(alpha), M=M, N=N, n_ops=n_ops,
        mask_rows=mask_rows, mask_cols=mask_cols)

    out = pl.pallas_call(
        kernel,
        out_shape=jax.ShapeDtypeStruct((1, split * 128), jnp.float32),
        grid_spec=pltpu.PrefetchScalarGridSpec(
            num_scalar_prefetch=0,
            grid=(split, n_j, n_k),
            in_specs=[pl.BlockSpec((tile_m, tile_n), in_map)] * n_ops,
            out_specs=pl.BlockSpec((1, 128), lambda c, j, k: (0, c)),
            scratch_shapes=[pltpu.VMEM((8, tile_n), jnp.float32)],
        ),
        compiler_params=pltpu.CompilerParams(
            dimension_semantics=("parallel", "arbitrary", "arbitrary"),
            vmem_limit_bytes=int(vmem_limit),
        ),
    )(*arrays)
    # Each core broadcast its scalar partial across its (1, 128) output slice.
    return jnp.sum(out.reshape(split, 128)[:, 0])


def myloss(one_index, zero_index, input_, target, alpha=ALPHA,
           assume_partition=True, **tile_kwargs):
    """JAX/Pallas equivalent of Myloss.forward.

    one_index / zero_index: int arrays of shape (2, K) giving (row, col)
    positions into the loss matrix (PyTorch advanced indexing loss_sum[[r, c]]).

    assume_partition=True exploits that in MML-MGNN one_index / zero_index are
    exactly nonzero(target) / nonzero(1 - target) with a strictly binary
    target, so the weight alpha + (1-2*alpha)*target is computed in-kernel and
    only input & target stream from HBM.  Set False for arbitrary / duplicated
    index sets (exact general semantics via int8 scatter-added counts).
    """
    if assume_partition:
        return _weighted_sq_err_sum([input_, target], alpha=alpha, **tile_kwargs)
    # TODO(synk): for K << M*N a gather + segment-sum would beat dense int8
    # counts; dense counts keep the streaming kernel uniform.
    shape = input_.shape
    c1 = jnp.zeros(shape, jnp.int32).at[one_index[0], one_index[1]].add(1).astype(jnp.int8)
    c0 = jnp.zeros(shape, jnp.int32).at[zero_index[0], zero_index[1]].add(1).astype(jnp.int8)
    return _weighted_sq_err_sum([input_, target, c1, c0], alpha=alpha, **tile_kwargs)


def _reference(one_index, zero_index, input_, target, alpha=ALPHA):
    loss_sum = (input_.astype(jnp.float32) - target.astype(jnp.float32)) ** 2
    return ((1.0 - alpha) * loss_sum[one_index[0], one_index[1]].sum()
            + alpha * loss_sum[zero_index[0], zero_index[1]].sum())


def _run_case(key, M, N, dtype, assume_partition=True, **tile_kwargs):
    k1, k2 = jax.random.split(key)
    # "input" = predicted association scores, "target" = binary association matrix.
    x = jax.random.uniform(k1, (M, N), dtype=jnp.float32)
    mask = jax.random.uniform(k2, (M, N)) > 0.8
    target = mask.astype(jnp.float32)

    mask_np = np.asarray(mask)
    one_index = jnp.asarray(np.stack(np.nonzero(mask_np), 0).astype(np.int32))
    zero_index = jnp.asarray(np.stack(np.nonzero(~mask_np), 0).astype(np.int32))

    x_d = x.astype(dtype)
    t_d = target.astype(dtype)
    ref = jax.block_until_ready(_reference(one_index, zero_index, x_d, t_d))
    out = jax.block_until_ready(
        myloss(one_index, zero_index, x_d, t_d,
               assume_partition=assume_partition, **tile_kwargs))
    np.testing.assert_allclose(np.asarray(out), np.asarray(ref),
                               rtol=3e-5, atol=1e-3)


if __name__ == "__main__":
    root = jax.random.PRNGKey(0)
    keys = jax.random.split(root, 6)

    _run_case(keys[0], 48, 256, jnp.float32)                            # aligned, fast path
    _run_case(keys[1], 37, 150, jnp.float32)                            # ragged rows + lanes
    _run_case(keys[2], 48, 256, jnp.bfloat16)                           # native bf16 streaming
    _run_case(keys[3], 48, 256, jnp.float32, assume_partition=False)    # int8-count general path
    _run_case(keys[4], 100, 200, jnp.float32,                           # multi-step grid, both masks
              max_tile_m=32, max_tile_n=128)
    _run_case(keys[5], 100, 200, jnp.float32, assume_partition=False,
              max_tile_m=32, max_tile_n=128)

    print("KERNEL_OK")
</pallas_src>

<mosaic_0001>
module attributes {stable_mosaic.version = 11 : i64} {
  func.func @_loss_kernel(%arg0: i32, %arg1: i32, %arg2: i32, %arg3: memref<64x256xf32, #tpu.memory_space<vmem>>, %arg4: memref<64x256xf32, #tpu.memory_space<vmem>>, %arg5: memref<1x128xf32, #tpu.memory_space<vmem>>, %arg6: memref<8x256xf32, #tpu.memory_space<vmem>>) attributes {dimension_semantics = [#tpu.dimension_semantics<parallel>, #tpu.dimension_semantics<arbitrary>, #tpu.dimension_semantics<arbitrary>], iteration_bounds = array<i64: 1, 1, 1>, scalar_prefetch = 0 : i64, scratch_operands = 1 : i64, tpu.core_type = #tpu.core_type<tc>, window_params = [{transform_indices = @transform_0, window_bounds = array<i64: 64, 256>}, {transform_indices = @transform_1, window_bounds = array<i64: 64, 256>}, {transform_indices = @transform_2, window_bounds = array<i64: 1, 128>}]} {
    %c0_i32 = arith.constant 0 : i32
    %0 = arith.cmpi eq, %arg1, %c0_i32 : i32
    %c0_i32_0 = arith.constant 0 : i32
    %1 = arith.cmpi eq, %arg2, %c0_i32_0 : i32
    %2 = arith.andi %0, %1 : i1
    %3 = arith.extui %2 : i1 to i32
    %c0_i32_1 = arith.constant 0 : i32
    %4 = arith.cmpi ne, %3, %c0_i32_1 : i32
    scf.if %4 {
      %cst_15 = arith.constant 0.000000e+00 : f32
      %34 = vector.broadcast %cst_15 : f32 to vector<8x256xf32>
      %c0_16 = arith.constant 0 : index
      %c0_17 = arith.constant 0 : index
      %35 = vector.load %arg6[%c0_16, %c0_17] : memref<8x256xf32, #tpu.memory_space<vmem>>, vector<8x256xf32>
      tpu.vector_store %arg6[%c0_16, %c0_17], %34 {strides = array<i32>} : memref<8x256xf32, #tpu.memory_space<vmem>>, vector<8x256xf32>,
    } else {
    }
    %c0 = arith.constant 0 : index
    %c0_2 = arith.constant 0 : index
    %5 = vector.load %arg3[%c0, %c0_2] : memref<64x256xf32, #tpu.memory_space<vmem>>, vector<64x256xf32>
    %c0_3 = arith.constant 0 : index
    %c0_4 = arith.constant 0 : index
    %6 = vector.load %arg4[%c0_3, %c0_4] : memref<64x256xf32, #tpu.memory_space<vmem>>, vector<64x256xf32>
    %7 = arith.subf %5, %6 : vector<64x256xf32>
    %cst = arith.constant 6.000000e-01 : f32
    %8 = vector.broadcast %cst : f32 to vector<64x256xf32>
    %9 = arith.mulf %8, %6 : vector<64x256xf32>
    %cst_5 = arith.constant 2.000000e-01 : f32
    %10 = vector.broadcast %cst_5 : f32 to vector<64x256xf32>
    %11 = arith.addf %10, %9 : vector<64x256xf32>
    %12 = arith.mulf %11, %7 : vector<64x256xf32>
    %13 = arith.mulf %12, %7 : vector<64x256xf32>
    %c1_i32 = arith.constant 1 : i32
    %14 = arith.muli %arg0, %c1_i32 : i32
    %15 = arith.addi %14, %arg1 : i32
    %c64_i32 = arith.constant 64 : i32
    %16 = arith.muli %15, %c64_i32 : i32
    %17 = tpu.iota {dimensions = array<i32: 0>} : vector<64x256xi32>
    %18 = vector.broadcast %16 : i32 to vector<64x256xi32>
    %19 = arith.addi %18, %17 : vector<64x256xi32>
    %c48_i32 = arith.constant 48 : i32
    %20 = vector.broadcast %c48_i32 : i32 to vector<64x256xi32>
    %21 = arith.cmpi slt, %19, %20 : vector<64x256xi32>
    %cst_6 = arith.constant 0.000000e+00 : f32
    %22 = vector.broadcast %cst_6 : f32 to vector<64x256xf32>
    %23 = arith.select %21, %13, %22 : vector<64x256xi1>, vector<64x256xf32>
    %c0_7 = arith.constant 0 : index
    %c0_8 = arith.constant 0 : index
    %24 = vector.load %arg6[%c0_7, %c0_8] : memref<8x256xf32, #tpu.memory_space<vmem>>, vector<8x256xf32>
    %25 = vector.shape_cast %23 : vector<64x256xf32> to vector<8x8x256xf32>
    %cst_9 = arith.constant dense<0.000000e+00> : vector<8x256xf32>
    %26 = vector.multi_reduction <add>, %25, %cst_9 [0] : vector<8x8x256xf32> to vector<8x256xf32>
    %27 = arith.addf %24, %26 : vector<8x256xf32>
    %c0_10 = arith.constant 0 : index
    %c0_11 = arith.constant 0 : index
    %28 = vector.load %arg6[%c0_10, %c0_11] : memref<8x256xf32, #tpu.memory_space<vmem>>, vector<8x256xf32>
    tpu.vector_store %arg6[%c0_10, %c0_11], %27 {strides = array<i32>} : memref<8x256xf32, #tpu.memory_space<vmem>>, vector<8x256xf32>,
    %c0_i32_12 = arith.constant 0 : i32
    %29 = arith.cmpi eq, %arg1, %c0_i32_12 : i32
    %c0_i32_13 = arith.constant 0 : i32
    %30 = arith.cmpi eq, %arg2, %c0_i32_13 : i32
    %31 = arith.andi %29, %30 : i1
    %32 = arith.extui %31 : i1 to i32
    %c0_i32_14 = arith.constant 0 : i32
    %33 = arith.cmpi ne, %32, %c0_i32_14 : i32
    scf.if %33 {
      %c0_15 = arith.constant 0 : index
      %c0_16 = arith.constant 0 : index
      %34 = vector.load %arg6[%c0_15, %c0_16] : memref<8x256xf32, #tpu.memory_space<vmem>>, vector<8x256xf32>
      %35 = vector.shape_cast %34 : vector<8x256xf32> to vector<1x8x256xf32>
      %cst_17 = arith.constant dense<0.000000e+00> : vector<1xf32>
      %36 = vector.multi_reduction <add>, %35, %cst_17 [1, 2] : vector<1x8x256xf32> to vector<1xf32>
      %37 = vector.shape_cast %36 : vector<1xf32> to vector<1x1x1xf32>
      %38 = vector.extract %37[0, 0, 0] : f32 from vector<1x1x1xf32>
      %39 = vector.broadcast %38 : f32 to vector<1x1xf32>
      %40 = vector.shape_cast %39 : vector<1x1xf32> to vector<1x1xf32>
      %41 = vector.broadcast %40 : vector<1x1xf32> to vector<1x128xf32>
      %c0_18 = arith.constant 0 : index
      %c0_19 = arith.constant 0 : index
      %42 = vector.load %arg5[%c0_18, %c0_19] : memref<1x128xf32, #tpu.memory_space<vmem>>, vector<1x128xf32>
      tpu.vector_store %arg5[%c0_18, %c0_19], %41 {strides = array<i32>} : memref<1x128xf32, #tpu.memory_space<vmem>>, vector<1x128xf32>,
    } else {
    }
    return
  }
  func.func @transform_0(%arg0: i32, %arg1: i32, %arg2: i32) -> (i32, i32) {
    %c1_i32 = arith.constant 1 : i32
    %0 = arith.muli %arg0, %c1_i32 : i32
    %1 = arith.addi %0, %arg1 : i32
    %c0_i32 = arith.constant 0 : i32
    return %1, %arg2 : i32, i32
  }
  func.func @transform_1(%arg0: i32, %arg1: i32, %arg2: i32) -> (i32, i32) {
    %c1_i32 = arith.constant 1 : i32
    %0 = arith.muli %arg0, %c1_i32 : i32
    %1 = arith.addi %0, %arg1 : i32
    %c0_i32 = arith.constant 0 : i32
    return %1, %arg2 : i32, i32
  }
  func.func @transform_2(%arg0: i32, %arg1: i32, %arg2: i32) -> (i32, i32) {
    %c0_i32 = arith.constant 0 : i32
    %c0_i32_0 = arith.constant 0 : i32
    return %c0_i32, %arg0 : i32, i32
  }
}

</mosaic_0001>

<bundles_post_ra>
// kernel: tpu_custom_call.1
= control target key start
LH: loop header
LB: loop body
LE: loop exit
PB: predicated region body
PF: predicated region fallthrough
CT: control target
= control target key end

     0   :  { %7 = vsyncpa [#allocation4], 0  ;;  %s421_s0 = inlined_call_operand.hbm [shape: f32[48,256], index: 0, kind: input, shape index: {}]   ;;  %s422_s1 = inlined_call_operand.hbm [shape: f32[48,256], index: 1, kind: input, shape index: {}]   ;;  %s423_s2 = inlined_call_operand.hbm [shape: f32[1,128], index: 2, kind: output, shape index: {}]  }
   0x1   :  { %8 = vsyncpa [#allocation7], 0 }
   0x2   :  { %9 = vsyncpa [#allocation5], 0 }
   0x3   :  { %19 = vsyncadd [#allocation4], 512  ;;  %s365_s9 = smov [#allocation3]   ;;  %s293_s13 = scalar_lea.hbm %s421_s0, 1536 }
   0x4   :  { %s25_s10 = sshll.u32 %s365_s9, 4  ;;  %p294_p0 = scmp.ne.s32.totalorder %s421_s0, %s293_s13  ;;  %s26_s10 = int_to_ptr.vmem [resolvable:$true] %s25_s10 }
   0x5   :  { %p297_p1 = scmp.lt.u32.totalorder %s293_s13, %s421_s0 }
   0x7   :  { %p299_p2 = pnand %p297_p1, %p294_p0 }
   0x9   :  { %302 = shalt.err (!%p299_p2)
}
   0xa   :  { %s303_s18 = scalar_lea.vmem %s26_s10, 1536  ;;  %s307_s19 = scalar_lea.vmem %s26_s10, 2048 }
   0xb   :  { %p304_p3 = scmp.ne.s32.totalorder %s26_s10, %s303_s18  ;;  %p308_p4 = scmp.lt.s32.totalorder %s26_s10, %s26_s10 }
   0xc   :  { %p309_p5 = scmp.lt.s32.totalorder %s307_s19, %s303_s18 }
   0xe   :  { %p310_p6 = por %p309_p5, %p308_p4 }
  0x10   :  { %p311_p7 = pnand %p310_p6, %p304_p3 }
  0x12   :  { %314 = shalt.err (!%p311_p7)
}
  0x13   :  { %s366_s20 = smov 256   ;;  %s367_s21 = smov 16  }
  0x14   :  { %31 = dma.hbm_to_vmem [thread:$0]  %s421_s0, 1536, %s26_s10, [#allocation4], %s366_s20, %s366_s20, %s367_s21  }
  0x15   :  { %41 = vsyncadd [#allocation7], 512  ;;  %s368_s24 = smov [#allocation6]   ;;  %s315_s28 = scalar_lea.hbm %s422_s1, 1536 }
  0x16   :  { %s47_s25 = sshll.u32 %s368_s24, 4  ;;  %p316_p8 = scmp.ne.s32.totalorder %s422_s1, %s315_s28  ;;  %s48_s25 = int_to_ptr.vmem [resolvable:$true] %s47_s25 }
  0x17   :  { %p319_p9 = scmp.lt.u32.totalorder %s315_s28, %s422_s1 }
  0x19   :  { %p321_p10 = pnand %p319_p9, %p316_p8 }
  0x1b   :  { %324 = shalt.err (!%p321_p10)
}
  0x1c   :  { %s325_s5 = scalar_lea.vmem %s48_s25, 1536  ;;  %s329_s0 = scalar_lea.vmem %s48_s25, 2048 }
  0x1d   :  { %p326_p11 = scmp.ne.s32.totalorder %s48_s25, %s325_s5  ;;  %p330_p12 = scmp.lt.s32.totalorder %s48_s25, %s48_s25 }
  0x1e   :  { %p331_p13 = scmp.lt.s32.totalorder %s329_s0, %s325_s5 }
  0x20   :  { %p332_p0 = por %p331_p13, %p330_p12 }
  0x22   :  { %p333_p1 = pnand %p332_p0, %p326_p11 }
  0x24   :  { %336 = shalt.err (!%p333_p1)
}
  0x25   :  { %53 = dma.hbm_to_vmem [thread:$0]  %s422_s1, 1536, %s48_s25, [#allocation7], %s366_s20, %s366_s20, %s367_s21  }
  0x26   :  { %359 = dma.done.wait [#allocation4], 2048  }
  0x27   :  { %360 = vsyncadd [#allocation4], 4294965248 }
  0x28   :  { %361 = dma.done.wait [#allocation7], 2048  }
  0x29   :  { %362 = vsyncadd [#allocation7], 4294965248  ;;  %v78_v0 = vld [vmem:[#allocation3] sm:$0xff]  ;;  %v79_v1 = vld [vmem:[#allocation3 + $0x8] sm:$0xff]  ;;  %s369_s1 = smov [#allocation8]  }
  0x2a   :  { %v80_v2 = vld [vmem:[#allocation3 + $0x10] sm:$0xff]  ;;  %v81_v3 = vld [vmem:[#allocation3 + $0x18] sm:$0xff]  ;;  %v82_v4 = vld [vmem:[#allocation3 + $0x20] sm:$0xff]  ;;  %s276_s8 = sshll.u32 %s369_s1, 4  ;;  %s277_s8 = int_to_ptr.vmem [resolvable:$true] %s276_s8 }
  0x2b   :  { %v83_v5 = vld [vmem:[#allocation3 + $0x28] sm:$0xff]  ;;  %v84_v6 = vld [vmem:[#allocation3 + $0x30] sm:$0xff]  ;;  %v94_v7 = vld [vmem:[#allocation6] sm:$0xff]  ;;  %s337_s10 = scalar_lea.vmem %s277_s8, 16  ;;  %s341_s11 = scalar_lea.vmem %s277_s8, 32 }
  0x2c   :  { %v95_v8 = vld [vmem:[#allocation6 + $0x8] sm:$0xff]  ;;  %v85_v9 = vld [vmem:[#allocation3 + $0x38] sm:$0xff]  ;;  %v96_v10 = vld [vmem:[#allocation6 + $0x10] sm:$0xff]  ;;  %v110_v16 = vsub.f32 %v78_v0, %v94_v7  ;;  %v126_v17 = vmul.f32 0.6, %v94_v7  ;;  %p338_p2 = scmp.ne.s32.totalorder %s277_s8, %s337_s10  ;;  %p342_p3 = scmp.lt.s32.totalorder %s277_s8, %s277_s8 }
  0x2d   :  { %v97_v11 = vld [vmem:[#allocation6 + $0x18] sm:$0xff]  ;;  %v86_v12 = vld [vmem:[#allocation3 + $0x40] sm:$0xff]  ;;  %v99_v14 = vld [vmem:[#allocation6 + $0x28] sm:$0xff]  ;;  %v111_v22 = vsub.f32 %v79_v1, %v95_v8  ;;  %v112_v23 = vsub.f32 %v80_v2, %v96_v10  ;;  %v127_v25 = vmul.f32 0.6, %v95_v8  ;;  %p343_p4 = scmp.lt.s32.totalorder %s341_s11, %s337_s10 }
  0x2e   :  { %v98_v13 = vld [vmem:[#allocation6 + $0x20] sm:$0xff]  ;;  %v100_v15 = vld [vmem:[#allocation6 + $0x30] sm:$0xff]  ;;  %v87_v18 = vld [vmem:[#allocation3 + $0x48] sm:$0xff]  ;;  %v113_v24 = vsub.f32 %v81_v3, %v97_v11  ;;  %v115_v30 = vsub.f32 %v83_v5, %v99_v14  ;;  %v128_v31 = vmul.f32 0.6, %v96_v10 }
  0x2f   :  { %v101_v19 = vld [vmem:[#allocation6 + $0x38] sm:$0xff]  ;;  %v102_v20 = vld [vmem:[#allocation6 + $0x40] sm:$0xff]  ;;  %v103_v21 = vld [vmem:[#allocation6 + $0x48] sm:$0xff]  ;;  %v114_v29 = vsub.f32 %v82_v4, %v98_v13  ;;  %v129_v32 = vmul.f32 0.6, %v97_v11  ;;  %v116_v34 = vsub.f32 %v84_v6, %v100_v15  ;;  %p344_p5 = por %p343_p4, %p342_p3 }
  0x30   :  { %v88_v26 = vld [vmem:[#allocation3 + $0x50] sm:$0xff]  ;;  %v105_v28 = vld [vmem:[#allocation6 + $0x58] sm:$0xff]  ;;  %v130_v35 = vmul.f32 0.6, %v98_v13  ;;  %v131_v36 = vmul.f32 0.6, %v99_v14  ;;  %v117_v38 = vsub.f32 %v85_v9, %v101_v19  ;;  %v118_v42 = vsub.f32 %v86_v12, %v102_v20 }
  0x31   :  { %v104_v27 = vld [vmem:[#allocation6 + $0x50] sm:$0xff]  ;;  %v89_v33 = vld [vmem:[#allocation3 + $0x58] sm:$0xff]  ;;  %v132_v37 = vmul.f32 0.6, %v100_v15  ;;  %v133_v39 = vmul.f32 0.6, %v101_v19  ;;  %v119_v46 = vsub.f32 %v87_v18, %v103_v21  ;;  %p345_p6 = pnand %p344_p5, %p338_p2 }
  0x32   :  { %v134_v40 = vmul.f32 0.6, %v102_v20  ;;  %v135_v41 = vmul.f32 0.6, %v103_v21  ;;  %v136_v43 = vmul.f32 0.6, %v104_v27  ;;  %v120_v50 = vsub.f32 %v88_v26, %v104_v27 }
  0x33   :  { %v137_v44 = vmul.f32 0.6, %v105_v28  ;;  %v142_v45 = vadd.f32 0.2, %v126_v17  ;;  %v143_v47 = vadd.f32 0.2, %v127_v25  ;;  %v121_v54 = vsub.f32 %v89_v33, %v105_v28 }
  0x34   :  { %v144_v48 = vadd.f32 0.2, %v128_v31  ;;  %v145_v49 = vadd.f32 0.2, %v129_v32  ;;  %v146_v51 = vadd.f32 0.2, %v130_v35 }
  0x35   :  { %v147_v52 = vadd.f32 0.2, %v131_v36  ;;  %v148_v53 = vadd.f32 0.2, %v132_v37  ;;  %v149_v55 = vadd.f32 0.2, %v133_v39  ;;  %v158_v56 = vmul.f32 %v142_v45, %v110_v16 }
  0x36   :  { %v159_v57 = vmul.f32 %v143_v47, %v111_v22  ;;  %v150_v58 = vadd.f32 0.2, %v134_v40  ;;  %v151_v59 = vadd.f32 0.2, %v135_v41  ;;  %v160_v60 = vmul.f32 %v144_v48, %v112_v23 }
  0x37   :  { %v161_v61 = vmul.f32 %v145_v49, %v113_v24  ;;  %v152_v62 = vadd.f32 0.2, %v136_v43  ;;  %v153_v63 = vadd.f32 0.2, %v137_v44  ;;  %v162_v0 = vmul.f32 %v146_v51, %v114_v29 }
  0x38   :  { %v163_v1 = vmul.f32 %v147_v52, %v115_v30  ;;  %v164_v2 = vmul.f32 %v148_v53, %v116_v34  ;;  %v165_v3 = vmul.f32 %v149_v55, %v117_v38  ;;  %v174_v4 = vmul.f32 %v158_v56, %v110_v16 }
  0x39   :  { %v175_v5 = vmul.f32 %v159_v57, %v111_v22  ;;  %v176_v6 = vmul.f32 %v160_v60, %v112_v23  ;;  %v177_v7 = vmul.f32 %v161_v61, %v113_v24  ;;  %v166_v8 = vmul.f32 %v150_v58, %v118_v42 }
  0x3a   :  { %v167_v9 = vmul.f32 %v151_v59, %v119_v46  ;;  %v178_v10 = vmul.f32 %v162_v0, %v114_v29  ;;  %v179_v11 = vmul.f32 %v163_v1, %v115_v30  ;;  %v168_v12 = vmul.f32 %v152_v62, %v120_v50 }
  0x3b   :  { %v169_v13 = vmul.f32 %v153_v63, %v121_v54  ;;  %v180_v14 = vmul.f32 %v164_v2, %v116_v34  ;;  %v181_v15 = vmul.f32 %v165_v3, %v117_v38  ;;  %v236_v17 = vadd.f32 %v176_v6, %v174_v4 }
  0x3c   :  { %v243_v18 = vadd.f32 %v177_v7, %v175_v5  ;;  %v182_v19 = vmul.f32 %v166_v8, %v118_v42  ;;  %v183_v20 = vmul.f32 %v167_v9, %v119_v46  ;;  %v184_v26 = vmul.f32 %v168_v12, %v120_v50 }
  0x3d   :  { %v237_v21 = vadd.f32 %v236_v17, %v178_v10  ;;  %v185_v27 = vmul.f32 %v169_v13, %v121_v54 }
  0x3e   :  { %v244_v25 = vadd.f32 %v243_v18, %v179_v11 }
  0x3f   :  { %v238_v16 = vadd.f32 %v237_v21, %v180_v14 }
  0x40   :  { %v245_v22 = vadd.f32 %v244_v25, %v181_v15 }
  0x41   :  { %v239_v23 = vadd.f32 %v238_v16, %v182_v19 }
  0x42   :  { %v246_v24 = vadd.f32 %v245_v22, %v183_v20 }
  0x43   :  { %v240_v28 = vadd.f32 %v239_v23, %v184_v26 }
  0x44   :  { %v247_v31 = vadd.f32 %v246_v24, %v185_v27 }
  0x46   :  { %v258_v29 = vadd.f32 %v247_v31, %v240_v28 }
  0x48   :  { %259 = vadd.xlane.f32.xlu0 %v258_v29 }
  0xd5   :  { %v260_v30 = vpop.xlane.xlu0 %259 }
  0xd6   :  { %v261_v32 = vrot.slane %v260_v30, 4 }
  0xd8   :  { %v262_v33 = vadd.f32 %v261_v32, %v260_v30 }
  0xda   :  { %v263_v34 = vrot.slane %v262_v33, 2 }
  0xdc   :  { %v264_v35 = vadd.f32 %v263_v34, %v262_v33 }
  0xde   :  { %v265_v36 = vrot.slane %v264_v35, 1 }
  0xe0   :  { %v266_v37 = vadd.f32 %v265_v36, %v264_v35 }
  0xe2   :  { %286 = vpush %v266_v37 }
 0x113   :  { %s287_s9 = spop %286 }
 0x114   :  { %v268_v38 = vstv %s287_s9 }
 0x115   :  { %269 = vst [vmem:[#allocation8] sm:$0x1] %v268_v38 }
 0x116   :  { %348 = shalt.err (!%p345_p6)
}
 0x117   :  { %s349_s14 = scalar_lea.hbm %s423_s2, 16 }
 0x118   :  { %p350_p7 = scmp.ne.s32.totalorder %s423_s2, %s349_s14  ;;  %p353_p8 = scmp.lt.u32.totalorder %s349_s14, %s423_s2 }
 0x11a   :  { %p355_p9 = pnand %p353_p8, %p350_p7 }
 0x11c   :  { %358 = shalt.err (!%p355_p9)
}
 0x11d   :  { %279 = dma.vmem_to_hbm [thread:$0]  %s277_s8, 16, %s423_s2, [#allocation5]  }
 0x11e   :  { %363 = dma.done.wait [#allocation5], 16  }
 0x11f   :  { %364 = vsyncadd [#allocation5], 4294967280 }
 0x120   :  { %283 = vsyncpa [#allocation4], 1 }
 0x121   :  { %284 = vsyncpa [#allocation7], 1 }
 0x122   :  { %285 = vsyncpa [#allocation5], 1 }

</bundles_post_ra>
